<compile_context>
chip_gen: v7x
topology: tpu7x:2x2x1
jax: 0.10.0
libtpu: 0.0.40
codegen_flags: <defaults>
</compile_context>

<pallas_src>
import jax
import jax.numpy as jnp
from jax.experimental import pallas as pl
from jax.experimental.pallas import tpu as pltpu

N_QUBITS = 4
N_LAYERS = 1
LANES = 128


def dqn_q_kernel(x_ref, wy_ref, o_ref):
    x = x_ref[...]          # (tile_r, 128)  flattened inputs
    wy = wy_ref[...]        # (1, 128)       45*cos(y_w), period-4 lane pattern
    # theta = atan(x): cos(theta) = rsqrt(1 + x^2)  (exact, no atan needed)
    # out = 90*(1+<Z>)/2 = 45 + 45*cos(y)*cos(atan(x))
    o_ref[...] = 45.0 + wy * jax.lax.rsqrt(1.0 + x * x)


def _round_up(v, m):
    return (v + m - 1) // m * m


def _tile_rows(rows, block_rows):
    """Pick the per-grid-step row tile for a (rows, 128) layout."""
    if rows < 16:
        # Single block equal to the full row extent (exempt from the
        # multiple-of-8 rule); nothing to split across cores at this size.
        return rows
    # At least 2 grid steps so both v7x TensorCores get work; stream in
    # block_rows-sized chunks for large batches.  Tile must be a multiple of 8.
    n_blocks = max(2, pl.cdiv(rows, block_rows))
    return min(block_rows, _round_up(pl.cdiv(rows, n_blocks), 8))


def dqn_q_forward(x, y_weights, z_weights, *, block_rows=2048):
    """x: (B, 4); y_weights/z_weights: (n_layers, 4). Returns (B, 4) float32."""
    del z_weights  # RZ (and the CZ ring) are diagonal -> cancel in <Z_w>.
    B, Q = x.shape
    assert Q == N_QUBITS, f"expected {N_QUBITS} qubits, got {Q}"
    # The closed form only holds for the single-layer circuit in the module.
    assert y_weights.shape == (N_LAYERS, N_QUBITS), (
        "closed-form collapse assumes n_layers == 1")
    x = x.astype(jnp.float32)

    # Weight prep (plain JAX glue): 45*cos(y_w), tiled lane-dense to width 128.
    # Flattened element k maps to qubit k % 4 and lane k % 128; 128 % 4 == 0,
    # so a single period-4 (1, 128) row broadcasts correctly over sublanes.
    wy4 = 45.0 * jnp.cos(y_weights[0].astype(jnp.float32))        # (4,)
    wy = jnp.tile(wy4, LANES // Q)[None, :]                       # (1, 128)

    n = B * Q
    aligned = (n % LANES) == 0
    if aligned:
        # Fast path: free row-major reshape, no padding, no unpad slice.
        rows = n // LANES
        xf = x.reshape(rows, LANES)
        io_aliases = {}            # xf is (a view of) the caller's array
    else:
        # Minimal padding: only up to the next multiple of 8 rows.
        rows = _round_up(pl.cdiv(n, LANES), 8)
        xf = jnp.pad(x.reshape(-1), (0, rows * LANES - n)).reshape(rows, LANES)
        io_aliases = {0: 0}        # xf is a fresh temp -> donate it as output

    tile_r = _tile_rows(rows, block_rows)
    grid = (pl.cdiv(rows, tile_r),)   # edge block (if any) is masked by Pallas

    cost = pl.CostEstimate(
        flops=3 * rows * LANES,
        transcendentals=rows * LANES,
        bytes_accessed=2 * rows * LANES * 4 + LANES * 4,
    )

    out = pl.pallas_call(
        dqn_q_kernel,
        out_shape=jax.ShapeDtypeStruct((rows, LANES), jnp.float32),
        grid=grid,
        in_specs=[
            pl.BlockSpec((tile_r, LANES), lambda i: (i, 0)),      # x blocks
            pl.BlockSpec((1, LANES), lambda i: (0, 0)),           # weights (constant block)
        ],
        out_specs=pl.BlockSpec((tile_r, LANES), lambda i: (i, 0)),
        input_output_aliases=io_aliases,
        cost_estimate=cost,
        compiler_params=pltpu.CompilerParams(
            dimension_semantics=("parallel",)),
    )(xf, wy)

    if aligned:
        return out.reshape(B, Q)                   # free reshape
    return out.reshape(-1)[:n].reshape(B, Q)       # drop pad rows


def dqn_q_reference(x, y_weights, z_weights):
    """Pure-JAX reference: <Z_w> = cos(y_w) * cos(atan(x_w))."""
    theta = jnp.arctan(x.astype(jnp.float32))
    expz = jnp.cos(y_weights[0].astype(jnp.float32))[None, :] * jnp.cos(theta)
    return 90.0 * (1.0 + expz) * 0.5


if __name__ == "__main__":
    key = jax.random.PRNGKey(0)
    kx, ky, kz, kx2, kx3, kx4 = jax.random.split(key, 6)

    # TorchLayer default init: uniform in [0, 2*pi)
    y_weights = jax.random.uniform(ky, (N_LAYERS, N_QUBITS),
                                   minval=0.0, maxval=2.0 * jnp.pi,
                                   dtype=jnp.float32)
    z_weights = jax.random.uniform(kz, (N_LAYERS, N_QUBITS),
                                   minval=0.0, maxval=2.0 * jnp.pi,
                                   dtype=jnp.float32)

    def check(xb):
        out = jax.block_until_ready(dqn_q_forward(xb, y_weights, z_weights))
        ref = dqn_q_reference(xb, y_weights, z_weights)
        assert out.shape == xb.shape
        assert jnp.max(jnp.abs(out - ref)) < 1e-4

    # 1) tiny batch -> padded path, single block
    check(jax.random.normal(kx, (8, N_QUBITS), dtype=jnp.float32))
    # 2) aligned batch -> zero-copy fast path, single block (rows=2)
    check(jax.random.normal(kx2, (64, N_QUBITS), dtype=jnp.float32))
    # 3) ragged batch -> padded path, 2-step grid (exercises masked edge block)
    check(jax.random.normal(kx3, (333, N_QUBITS), dtype=jnp.float32))
    # 4) aligned batch -> zero-copy fast path, 2-step grid (v7x dual-TC split)
    check(jax.random.normal(kx4, (1024, N_QUBITS), dtype=jnp.float32))

    print("KERNEL_OK")
</pallas_src>

<mosaic_0001>
module attributes {stable_mosaic.version = 11 : i64} {
  func.func @dqn_q_kernel(%arg0: i32, %arg1: memref<8x128xf32, #tpu.memory_space<vmem>>, %arg2: memref<1x128xf32, #tpu.memory_space<vmem>>, %arg3: memref<8x128xf32, #tpu.memory_space<vmem>>) attributes {dimension_semantics = [#tpu.dimension_semantics<parallel>], iteration_bounds = array<i64: 1>, scalar_prefetch = 0 : i64, scratch_operands = 0 : i64, tpu.core_type = #tpu.core_type<tc>, window_params = [{transform_indices = @transform_0, window_bounds = array<i64: 8, 128>}, {pipeline_mode = #tpu.pipeline_mode<synchronous>, transform_indices = @transform_1, window_bounds = array<i64: 1, 128>}, {transform_indices = @transform_2, window_bounds = array<i64: 8, 128>}]} {
    %c0 = arith.constant 0 : index
    %c0_0 = arith.constant 0 : index
    %0 = vector.load %arg1[%c0, %c0_0] : memref<8x128xf32, #tpu.memory_space<vmem>>, vector<8x128xf32>
    %c0_1 = arith.constant 0 : index
    %c0_2 = arith.constant 0 : index
    %1 = vector.load %arg2[%c0_1, %c0_2] : memref<1x128xf32, #tpu.memory_space<vmem>>, vector<1x128xf32>
    %2 = arith.mulf %0, %0 : vector<8x128xf32>
    %cst = arith.constant 1.000000e+00 : f32
    %3 = vector.broadcast %cst : f32 to vector<8x128xf32>
    %4 = arith.addf %3, %2 : vector<8x128xf32>
    %5 = math.rsqrt %4 : vector<8x128xf32>
    %6 = vector.broadcast %1 : vector<1x128xf32> to vector<8x128xf32>
    %7 = arith.mulf %6, %5 : vector<8x128xf32>
    %cst_3 = arith.constant 4.500000e+01 : f32
    %8 = vector.broadcast %cst_3 : f32 to vector<8x128xf32>
    %9 = arith.addf %8, %7 : vector<8x128xf32>
    %c0_4 = arith.constant 0 : index
    %c0_5 = arith.constant 0 : index
    %10 = vector.load %arg3[%c0_4, %c0_5] : memref<8x128xf32, #tpu.memory_space<vmem>>, vector<8x128xf32>
    tpu.vector_store %arg3[%c0_4, %c0_5], %9 {strides = array<i32>} : memref<8x128xf32, #tpu.memory_space<vmem>>, vector<8x128xf32>,
    return
  }
  func.func @transform_0(%arg0: i32) -> (i32, i32) {
    %c0_i32 = arith.constant 0 : i32
    %c0_i32_0 = arith.constant 0 : i32
    return %arg0, %c0_i32 : i32, i32
  }
  func.func @transform_1(%arg0: i32) -> (i32, i32) {
    %c0_i32 = arith.constant 0 : i32
    %c0_i32_0 = arith.constant 0 : i32
    %c0_i32_1 = arith.constant 0 : i32
    return %c0_i32, %c0_i32_0 : i32, i32
  }
  func.func @transform_2(%arg0: i32) -> (i32, i32) {
    %c0_i32 = arith.constant 0 : i32
    %c0_i32_0 = arith.constant 0 : i32
    return %arg0, %c0_i32 : i32, i32
  }
}

</mosaic_0001>

<bundles_post_ra>
// kernel: tpu_custom_call.1
= control target key start
LH: loop header
LB: loop body
LE: loop exit
PB: predicated region body
PF: predicated region fallthrough
CT: control target
= control target key end

     0   :  { %7 = vsyncpa [#allocation3], 0  ;;  %s150_s0 = inlined_call_operand.hbm [shape: f32[8,128], index: 0, kind: input, shape index: {}, may-alias: {0,2}]   ;;  %s151_s1 = inlined_call_operand.vmem [shape: f32[1,128], index: 1, kind: input, shape index: {}]   ;;  %s152_s2 = inlined_call_operand.hbm [shape: f32[8,128], index: 2, kind: output, shape index: {}, may-alias: {0,2}]  }
   0x1   :  { %8 = vsyncpa [#allocation4], 0  ;;  %s106_s9 = smov [#allocation2]   ;;  %s58_s13 = scalar_lea.hbm %s150_s0, 128 }
   0x2   :  { %s15_s10 = sshll.u32 %s106_s9, 4  ;;  %p59_p0 = scmp.ne.s32.totalorder %s150_s0, %s58_s13  ;;  %s16_s10 = int_to_ptr.vmem [resolvable:$true] %s15_s10 }
   0x3   :  { %p62_p1 = scmp.lt.u32.totalorder %s58_s13, %s150_s0 }
   0x5   :  { %p64_p2 = pnand %p62_p1, %p59_p0 }
   0x7   :  { %67 = shalt.err (!%p64_p2)
}
   0x8   :  { %s68_s18 = scalar_lea.vmem %s16_s10, 128  ;;  %p73_p4 = scmp.lt.s32.totalorder %s16_s10, %s16_s10 }
   0x9   :  { %p69_p3 = scmp.ne.s32.totalorder %s16_s10, %s68_s18  ;;  %p74_p5 = scmp.lt.s32.totalorder %s68_s18, %s68_s18 }
   0xb   :  { %p75_p6 = por %p74_p5, %p73_p4 }
   0xd   :  { %p76_p7 = pnand %p75_p6, %p69_p3 }
   0xf   :  { %79 = shalt.err (!%p76_p7)
}
  0x10   :  { %18 = dma.hbm_to_vmem [thread:$0]  %s150_s0, 128, %s16_s10, [#allocation3]  }
  0x11   :  { %102 = dma.done.wait [#allocation3], 128  }
  0x12   :  { %103 = vsyncadd [#allocation3], 4294967168  ;;  %v24_v0 = vld [vmem:[#allocation2] sm:$0xff]  ;;  %s107_s23 = smov [#allocation5]  }
  0x13   :  { %v26_v1 = vmul.f32 %v24_v0, %v24_v0  ;;  %v53_v3 = vld [vmem:[%s151_s1] ss:$0 sm:$0xff]  ;;  %s44_s24 = sshll.u32 %s107_s23, 4  ;;  %s45_s24 = int_to_ptr.vmem [resolvable:$true] %s44_s24 }
  0x14   :  { %s80_s25 = scalar_lea.vmem %s45_s24, 128  ;;  %p85_p9 = scmp.lt.s32.totalorder %s45_s24, %s45_s24 }
  0x15   :  { %v27_v2 = vadd.f32 1.0, %v26_v1  ;;  %p81_p8 = scmp.ne.s32.totalorder %s45_s24, %s80_s25  ;;  %p86_p10 = scmp.lt.s32.totalorder %s80_s25, %s80_s25 }
  0x17   :  { %56 = vrsqrt.f32 %v27_v2  ;;  %p87_p11 = por %p86_p10, %p85_p9 }
  0x19   :  { %p88_p12 = pnand %p87_p11, %p81_p8 }
  0x21   :  { %v57_v4 = vpop.eup %56 }
  0x22   :  { %v35_v5 = vmul.f32 %v57_v4, %v53_v3 }
  0x24   :  { %v36_v6 = vadd.f32 45.0, %v35_v5 }
  0x26   :  { %37 = vst [vmem:[#allocation5] sm:$0xff] %v36_v6 }
  0x27   :  { %91 = shalt.err (!%p88_p12)
}
  0x28   :  { %s92_s27 = scalar_lea.hbm %s152_s2, 128 }
  0x29   :  { %p93_p13 = scmp.ne.s32.totalorder %s152_s2, %s92_s27  ;;  %p96_p0 = scmp.lt.u32.totalorder %s92_s27, %s152_s2 }
  0x2b   :  { %p98_p1 = pnand %p96_p0, %p93_p13 }
  0x2d   :  { %101 = shalt.err (!%p98_p1)
}
  0x2e   :  { %47 = dma.vmem_to_hbm [thread:$0]  %s45_s24, 128, %s152_s2, [#allocation4]  }
  0x2f   :  { %104 = dma.done.wait [#allocation4], 128  }
  0x30   :  { %105 = vsyncadd [#allocation4], 4294967168 }
  0x31   :  { %51 = vsyncpa [#allocation3], 1 }
  0x32   :  { %52 = vsyncpa [#allocation4], 1 }

</bundles_post_ra>
